<compile_context>
chip_gen: v5e
topology: v5e:2x2
jax: 0.10.0
libtpu: 0.0.40
codegen_flags: <defaults>
</compile_context>

<pallas_src>
import functools

import jax
import jax.numpy as jnp
from jax.experimental import pallas as pl
from jax.experimental.pallas import tpu as pltpu


def _conv_branch_kernel(x_ref, w_ref, b_ref, o_ref):
    """One parallel branch == one fused matmul, emitted NCHW-contiguous.

    x_ref: (K, N*HW)     bf16  im2col columns, pixels on the lane axis
    w_ref: (Cout, K)     bf16  shared flattened conv weight (rows match x rows)
    b_ref: (Cout, 1)     f32   shared bias
    o_ref: (N, Cout, HW) f32   per-branch output, already NCHW layout
    """
    n_batch, _, hw = o_ref.shape
    # Single K=36 contraction on the MXU, f32 accumulate.
    y = jnp.dot(w_ref[...], x_ref[...], preferred_element_type=jnp.float32)
    y = y + b_ref[...]                       # (Cout, N*HW) + (Cout, 1) broadcast
    for n in range(n_batch):                 # static, 128-aligned lane slices
        o_ref[n] = y[:, n * hw:(n + 1) * hw].astype(o_ref.dtype)


@functools.partial(jax.jit, static_argnames=("n", "hw"))
def _module_parallel_conv(x_cols, w_flat, bias_col, n, hw):
    # x_cols: (P, K, N*HW) bf16 ; w_flat: (Cout, K) bf16 ; bias_col: (Cout, 1) f32
    p, k, nhw = x_cols.shape
    cout = w_flat.shape[0]

    return pl.pallas_call(
        _conv_branch_kernel,
        out_shape=jax.ShapeDtypeStruct((p, n, cout, hw), jnp.float32),
        grid=(p,),
        in_specs=[
            pl.BlockSpec((pl.Squeezed(), k, nhw), lambda pi: (pi, 0, 0)),
            pl.BlockSpec((cout, k), lambda pi: (0, 0)),
            pl.BlockSpec((cout, 1), lambda pi: (0, 0)),
        ],
        out_specs=pl.BlockSpec(
            (pl.Squeezed(), n, cout, hw), lambda pi: (pi, 0, 0, 0)
        ),
        compiler_params=pltpu.CompilerParams(
            dimension_semantics=("parallel",)
        ),
    )(x_cols, w_flat, bias_col)


def _im2col_columns(x_nchw, kh, kw, pad):
    """NCHW -> (KH*KW*Cin, N*H*W) im2col; pixels on the trailing (lane) axis."""
    n, cin, h, w = x_nchw.shape
    xp = jnp.pad(x_nchw, ((0, 0), (0, 0), (pad, pad), (pad, pad)))
    taps = [
        xp[:, :, dy:dy + h, dx:dx + w]          # (N, Cin, H, W)
        for dy in range(kh) for dx in range(kw)
    ]
    t = jnp.stack(taps, axis=0)                 # (T, N, Cin, H, W)
    t = jnp.transpose(t, (0, 2, 1, 3, 4))       # (T, Cin, N, H, W)
    return t.reshape(kh * kw * cin, n * h * w)  # rows ordered (t, ci)


def module_parallel_conv2d(x_parallel, weight_oihw, bias):
    """ModuleParallel(nn.Conv2d(Cin, Cout, 3, padding=1)) forward.

    x_parallel: list of NCHW arrays (all same shape).
    Returns a list of NCHW arrays, one per parallel input, computed with the
    SAME (shared) conv weights — matching the PyTorch list-comprehension.
    """
    cout, cin, kh, kw = weight_oihw.shape
    n, _, h, w = x_parallel[0].shape
    pad = kh // 2

    # bf16 activations / weights at the pallas_call boundary; f32 accumulate
    # happens inside the kernel.
    x_cols = jnp.stack(
        [_im2col_columns(x, kh, kw, pad) for x in x_parallel], axis=0
    ).astype(jnp.bfloat16)                                       # (P, K, N*HW)
    w_flat = jnp.transpose(weight_oihw, (0, 2, 3, 1)).reshape(
        cout, kh * kw * cin
    ).astype(jnp.bfloat16)                                       # (Cout, K)
    bias_col = bias.reshape(cout, 1).astype(jnp.float32)

    out = _module_parallel_conv(x_cols, w_flat, bias_col, n=n, hw=h * w)
    out = out.reshape(out.shape[0], n, cout, h, w)               # free reshape
    return [out[i] for i in range(out.shape[0])]


def _reference_conv2d(x_nchw, weight_oihw, bias):
    y = jax.lax.conv_general_dilated(
        x_nchw, weight_oihw,
        window_strides=(1, 1), padding="SAME",
        dimension_numbers=("NCHW", "OIHW", "NCHW"),
    )
    return y + bias[None, :, None, None]


if __name__ == "__main__":
    P, N, CIN, COUT, H, W = 3, 2, 4, 8, 16, 16

    key = jax.random.PRNGKey(0)
    k_w, k_b, *k_xs = jax.random.split(key, 2 + P)

    # Deterministic synthetic Conv2d parameters (shapes per nn.Conv2d(4, 8, 3)).
    weight = jax.random.normal(k_w, (COUT, CIN, 3, 3), jnp.float32) * 0.1
    bias = jax.random.normal(k_b, (COUT,), jnp.float32) * 0.1

    # Parallel list of inputs (NCHW), as ModuleParallel expects.
    x_parallel = [
        jax.random.normal(k, (N, CIN, H, W), jnp.float32) for k in k_xs
    ]

    outs = module_parallel_conv2d(x_parallel, weight, bias)
    outs = [jax.block_until_ready(o) for o in outs]

    # Check each parallel branch against a plain-JAX f32 reference.
    # (bf16 kernel inputs -> looser tolerance than the pure-f32 version.)
    for x, o in zip(x_parallel, outs):
        ref = _reference_conv2d(x, weight, bias)
        assert o.shape == ref.shape == (N, COUT, H, W)
        assert jnp.allclose(o, ref, atol=3e-2, rtol=3e-2), (
            float(jnp.max(jnp.abs(o - ref)))
        )

    print("KERNEL_OK")
</pallas_src>

<mosaic_0001>
module attributes {stable_mosaic.version = 11 : i64} {
  func.func @_conv_branch_kernel(%arg0: i32, %arg1: memref<1x36x512xbf16, #tpu.memory_space<vmem>>, %arg2: memref<8x36xbf16, #tpu.memory_space<vmem>>, %arg3: memref<8x1xf32, #tpu.memory_space<vmem>>, %arg4: memref<1x2x8x256xf32, #tpu.memory_space<vmem>>) attributes {dimension_semantics = [#tpu.dimension_semantics<parallel>], iteration_bounds = array<i64: 3>, scalar_prefetch = 0 : i64, scratch_operands = 0 : i64, tpu.core_type = #tpu.core_type<tc>, window_params = [{transform_indices = @transform_0, window_bounds = array<i64: 1, 36, 512>}, {pipeline_mode = #tpu.pipeline_mode<synchronous>, transform_indices = @transform_1, window_bounds = array<i64: 8, 36>}, {pipeline_mode = #tpu.pipeline_mode<synchronous>, transform_indices = @transform_2, window_bounds = array<i64: 8, 1>}, {transform_indices = @transform_3, window_bounds = array<i64: 1, 2, 8, 256>}]} {
    %c0 = arith.constant 0 : index
    %c0_0 = arith.constant 0 : index
    %0 = vector.load %arg2[%c0, %c0_0] : memref<8x36xbf16, #tpu.memory_space<vmem>>, vector<8x36xbf16>
    %c0_1 = arith.constant 0 : index
    %c0_2 = arith.constant 0 : index
    %c0_3 = arith.constant 0 : index
    %1 = vector.load %arg1[%c0_1, %c0_2, %c0_3] : memref<1x36x512xbf16, #tpu.memory_space<vmem>>, vector<1x36x512xbf16>
    %2 = vector.shape_cast %1 : vector<1x36x512xbf16> to vector<36x512xbf16>
    %cst = arith.constant dense<0.000000e+00> : vector<8x512xf32>
    %3 = tpu.matmul %0, %2, %cst {dimension_numbers = #tpu.dot_dimension_numbers<[1], [0], [0], [1], [0, 0, 1, 1], [], []>} : vector<8x36xbf16>, vector<36x512xbf16>, vector<8x512xf32> -> vector<8x512xf32>
    %c0_4 = arith.constant 0 : index
    %c0_5 = arith.constant 0 : index
    %4 = vector.load %arg3[%c0_4, %c0_5] : memref<8x1xf32, #tpu.memory_space<vmem>>, vector<8x1xf32>
    %5 = vector.broadcast %4 : vector<8x1xf32> to vector<8x512xf32>
    %6 = arith.addf %3, %5 : vector<8x512xf32>
    %7 = vector.extract_strided_slice %6 {offsets = [0, 0], sizes = [8, 256], strides = [1, 1]} : vector<8x512xf32> to vector<8x256xf32>
    %c0_6 = arith.constant 0 : index
    %c0_7 = arith.constant 0 : index
    %c0_8 = arith.constant 0 : index
    %c0_9 = arith.constant 0 : index
    %8 = vector.load %arg4[%c0_6, %c0_7, %c0_8, %c0_9] : memref<1x2x8x256xf32, #tpu.memory_space<vmem>>, vector<1x1x8x256xf32>
    %9 = vector.shape_cast %8 : vector<1x1x8x256xf32> to vector<8x256xf32>
    %10 = vector.shape_cast %7 : vector<8x256xf32> to vector<1x1x8x256xf32>
    tpu.vector_store %arg4[%c0_6, %c0_7, %c0_8, %c0_9], %10 {strides = array<i32>} : memref<1x2x8x256xf32, #tpu.memory_space<vmem>>, vector<1x1x8x256xf32>,
    %11 = vector.extract_strided_slice %6 {offsets = [0, 256], sizes = [8, 256], strides = [1, 1]} : vector<8x512xf32> to vector<8x256xf32>
    %c0_10 = arith.constant 0 : index
    %c1 = arith.constant 1 : index
    %c0_11 = arith.constant 0 : index
    %c0_12 = arith.constant 0 : index
    %12 = vector.load %arg4[%c0_10, %c1, %c0_11, %c0_12] : memref<1x2x8x256xf32, #tpu.memory_space<vmem>>, vector<1x1x8x256xf32>
    %13 = vector.shape_cast %12 : vector<1x1x8x256xf32> to vector<8x256xf32>
    %14 = vector.shape_cast %11 : vector<8x256xf32> to vector<1x1x8x256xf32>
    tpu.vector_store %arg4[%c0_10, %c1, %c0_11, %c0_12], %14 {strides = array<i32>} : memref<1x2x8x256xf32, #tpu.memory_space<vmem>>, vector<1x1x8x256xf32>,
    return
  }
  func.func @transform_0(%arg0: i32) -> (i32, i32, i32) {
    %c0_i32 = arith.constant 0 : i32
    %c0_i32_0 = arith.constant 0 : i32
    %c0_i32_1 = arith.constant 0 : i32
    return %arg0, %c0_i32, %c0_i32_0 : i32, i32, i32
  }
  func.func @transform_1(%arg0: i32) -> (i32, i32) {
    %c0_i32 = arith.constant 0 : i32
    %c0_i32_0 = arith.constant 0 : i32
    %c0_i32_1 = arith.constant 0 : i32
    return %c0_i32, %c0_i32_0 : i32, i32
  }
  func.func @transform_2(%arg0: i32) -> (i32, i32) {
    %c0_i32 = arith.constant 0 : i32
    %c0_i32_0 = arith.constant 0 : i32
    %c0_i32_1 = arith.constant 0 : i32
    return %c0_i32, %c0_i32_0 : i32, i32
  }
  func.func @transform_3(%arg0: i32) -> (i32, i32, i32, i32) {
    %c0_i32 = arith.constant 0 : i32
    %c0_i32_0 = arith.constant 0 : i32
    %c0_i32_1 = arith.constant 0 : i32
    %c0_i32_2 = arith.constant 0 : i32
    return %arg0, %c0_i32, %c0_i32_0, %c0_i32_1 : i32, i32, i32, i32
  }
}

</mosaic_0001>

<bundles_post_ra>
// kernel: _module_parallel_conv.1
= control target key start
LH: loop header
LB: loop body
LE: loop exit
PB: predicated region body
PF: predicated region fallthrough
CT: control target
= control target key end

     0   :  { %8 = vsyncpa [#allocation3], 0  ;;  %s807_s0 = inlined_call_operand.hbm [shape: bf16[3,36,512], index: 0, kind: input, shape index: {}]   ;;  %s808_s1 = inlined_call_operand.vmem [shape: bf16[8,36], index: 1, kind: input, shape index: {}]   ;;  %s809_s2 = inlined_call_operand.vmem [shape: f32[8,1], index: 2, kind: input, shape index: {}]   ;;  %s810_s3 = inlined_call_operand.hbm [shape: f32[3,2,8,256], index: 3, kind: output, shape index: {}]  }
   0x1   :  { %10 = vsyncpa [#allocation3 + $0x1], 0 }
   0x2   :  { %11 = vsyncpa [#allocation4], 0 }
   0x3   :  { %13 = vsyncpa [#allocation4 + $0x1], 0  ;;  %s658_s12 = smov 0   ;;  %s660_s13 = smov 0  }
   0x4   :  { %s662_s14 = smov 0   ;;  %s664_s15 = smov 0  }
   0x5 LB: > { %s679_s16 = sadd.s32 4294967295, %s631_s15   ;;  %s422_s17 = sadd.s32 4294967294, %s631_s15   ;;  %s631_s15 = sphi %s664_s15, %s818_s15   ;;  %s627_s14 = sphi %s662_s14, %s817_s14   ;;  %s623_s13 = sphi %s660_s13, %s816_s13   ;;  %s619_s12 = sphi %s658_s12, %s815_s12  }
   0x6   : > { %s683_s18 = sadd.s32 1, %s631_s15   ;;  %s26_s19 = sadd.s32 1, %s627_s14 }
   0x7   : > { %s23_s20 = ssub.s32 %s631_s15, %s683_s18  ;;  %p33_p0 = scmp.ne.s32.totalorder %s627_s14, %s623_s13 }
   0x8   : > { %p24_p1 = scmp.eq.s32.totalorder %s23_s20, 0  ;;  %p34_p2 = scmp.eq.s32.totalorder %s631_s15, 0 }
   0x9   : > { %p39_p3 = scmp.ne.s32.totalorder %s623_s13, %s619_s12  ;;  %p40_p4 = scmp.eq.s32.totalorder %s679_s16, 0 }
   0xa   : > { %s695_s21 = scalar_select %p24_p1, %s627_s14, %s26_s19  }
   0xb   : > { %p35_p5 = por %p34_p2, %p33_p0  ;;  %p697_p6 = por %p40_p4, %p39_p3 }
   0xc   : > { %p105_p7 = scmp.eq.s32.totalorder %s679_s16, 2  ;;  %p111_p8 = scmp.eq.s32.totalorder %s422_s17, 2 }
   0xd   : > { %p495_p9 = scmp.lt.s32.totalorder %s631_s15, 3  ;;  %s137_s25 = sand.u32 1, %s627_s14  }
   0xe   : > { %p703_p10 = por %p105_p7, %p33_p0  ;;  %p707_p11 = por %p111_p8, %p39_p3 }
   0xf   : > { %s481_s26 = smul.u32 80, %s631_s15  ;;  %p716_p12 = pnand %p495_p9, %p35_p5 }
  0x10   : > { %s480_s27 = smul.u32 80, %s137_s25  ;;  %s138_s8 = scalar_lea.sflag [#allocation3], %s137_s25 }
  0x11   : > { %s146_s30 = scalar_lea.hbm %s807_s0, %s481_s26  ;;  %p539_p0 = pneg %p716_p12 }
  0x12   : > { %s147_s5 = sshll.u32 %s146_s30, 4  ;;  %s141_s6 = scalar_lea.vmem [#allocation2], %s480_s27  ;;  %s148_s5 = int_to_ptr.hbm [resolvable:$true] %s147_s5 }
  0x13   : > { %s149_s7 = sshll.u32 %s141_s6, 4  ;;  %s535_s9 = sshra.s32 %s148_s5, 4  ;;  %s150_s7 = int_to_ptr.vmem [resolvable:$true] %s149_s7  ;;  %s536_s9 = int_to_ptr.hbm [resolvable:$true] %s535_s9 }
  0x14   : > { %s537_s10 = scalar_lea.hbm %s536_s9, 80  ;;  %s542_s19 = scalar_lea.hbm %s807_s0, 240 }
  0x15   : > { %p538_p13 = scmp.ne.s32.totalorder %s536_s9, %s537_s10  ;;  %p543_p3 = scmp.lt.s32.totalorder %s536_s9, %s807_s0 }
  0x16   : > { %p544_p4 = scmp.lt.s32.totalorder %s542_s19, %s537_s10 }
  0x17   : > { %p540_p1 = pnand %p539_p0, %p538_p13 }
  0x18   : > { %p545_p5 = por %p544_p4, %p543_p3 }
  0x19   : > { %p541_p2 = pneg %p540_p1 }
  0x1b   : > { %p546_p7 = pnand %p545_p5, %p541_p2 }
  0x1d   : > { %549 = shalt.err (!%p546_p7)
}
  0x1e   : > { %s633_s25 = smov 256   ;;  %s634_s27 = smov 16  }
  0x1f   : > { %490 = dma.hbm_to_vmem [thread:$0]  (!%p716_p12), %s148_s5, 1280, %s150_s7, %s138_s8, %s633_s25, %s633_s25, %s634_s27  }
  0x20   : > { %p426_p8 = scmp.ge.s32.totalorder %s631_s15, 1  ;;  %p157_p9 = scmp.lt.s32.totalorder %s631_s15, 4 }
  0x22   : > { %p158_p13 = pnand %p426_p8, %p157_p9 }
  0x23   : > { %s733_s28 = sand.u32 (!%p158_p13), 1, %s623_s13  }
  0x24   : > { %161 = sbr.rel (%p158_p13) target bundleno = 200 (0xc8), region = 32  ;;  %s164_s30 = scalar_lea.sflag (!%p158_p13), [#allocation3], %s733_s28 }
  0x25   : > { %s482_s29 = smul.u32 (!%p158_p13), 80, %s733_s28 }
  0x27   : > { %s737_s6 = scalar_lea.vmem (!%p158_p13), [#allocation2], %s482_s29 }
  0x29   : > { %610 = dma.done.wait (%p697_p6), %s164_s30, 1280  }
  0x2a   : > { %612 = vsyncadd (%p697_p6), %s164_s30, 4294966016  ;;  %v635_v0 = vmov 0   ;;  %v201_v1 = vld [vmem:[%s737_s6 + $0x40] sm:$0x33]  ;;  %v202_v2 = vld [vmem:[%s737_s6 + $0x48] sm:$0x33] }
  0x2b   : > { %534 = vset.pattern.permute.xlu0 %v635_v0  ;;  %v235_v3 = vunpack.c.l.b16 %v201_v1  ;;  %v236_v4 = vunpack.c.h.b16 %v201_v1  ;;  %v237_v5 = vunpack.c.l.b16 %v202_v2  ;;  %v238_v6 = vunpack.c.h.b16 %v202_v2  ;;  %v446_v7 = vld [vmem:[%s737_s6 + $0x20] sm:$0xf]  ;;  %v477_v8 = vld [vmem:[%s737_s6 + $0x2c] sm:$0xf0]  ;;  %v475_v13 = vld [vmem:[%s737_s6 + $0x24] sm:$0xf] }
  0x2c   : > { %vm263_vm0 = vcmask 1041408   ;;  %v448_v14 = vld [vmem:[%s737_s6 + $0x30] sm:$0xf0]  ;;  %v454_v15 = vld [vmem:[%s737_s6 + $0x28] sm:$0xf]  ;;  %v447_v23 = vor.u32 %v477_v8, %v446_v7  ;;  %vm259_vm1 = vcmask 293888  }
  0x2d   : > { %v247_v9 = vpack.c.b16 %v235_v3, %v235_v3  ;;  %v248_v10 = vpack.c.b16 %v236_v4, %v236_v4  ;;  %v249_v11 = vpack.c.b16 %v237_v5, %v237_v5  ;;  %v250_v12 = vpack.c.b16 %v238_v6, %v238_v6  ;;  %v478_v16 = vld [vmem:[%s737_s6 + $0x34] sm:$0xf0]  ;;  %v476_v17 = vld [vmem:[%s737_s6 + $0x2c] sm:$0xf]  ;;  %v456_v18 = vld [vmem:[%s737_s6 + $0x38] sm:$0xf0] }
  0x2e   : > { %v451_v24 = vor.u32 %v475_v13, %v448_v14  ;;  %v430_v25 = vld [vmem:[%s737_s6] sm:$0xf]  ;;  %v473_v26 = vld [vmem:[%s737_s6 + $0xc] sm:$0xf0]  ;;  %v471_v27 = vld [vmem:[%s737_s6 + $0x4] sm:$0xf]  ;;  %v455_v28 = vor.u32 %v478_v16, %v454_v15  ;;  %v459_v29 = vor.u32 %v476_v17, %v456_v18 }
  0x2f   : > { %v265_v19 = vsel %vm263_vm0, %v247_v9, 0  ;;  %v268_v20 = vsel %vm263_vm0, %v248_v10, 0  ;;  %v271_v21 = vsel %vm263_vm0, %v249_v11, 0  ;;  %v274_v22 = vsel %vm263_vm0, %v250_v12, 0  ;;  %v432_v30 = vld [vmem:[%s737_s6 + $0x10] sm:$0xf0] }
  0x30   : > { %281 = vmatpush.bf16.msra.mxu0 %v265_v19  ;;  %294 = vmatpush.bf16.msra.mxu1 %v268_v20  ;;  %v438_v31 = vld [vmem:[%s737_s6 + $0x8] sm:$0xf]  ;;  %v203_v32 = vld [vmem:[%s809_s2] sm:$0xff]  ;;  %v474_v33 = vld [vmem:[%s737_s6 + $0x14] sm:$0xf0]  ;;  %v431_v36 = vor.u32 %v473_v26, %v430_v25  ;;  %v435_v37 = vor.u32 %v471_v27, %v432_v30  ;;  %s427_s8 = sshll.u32 %s733_s28, 5 }
  0x31   : > { %307 = vmatpush.bf16.msra.mxu2 %v271_v21  ;;  %320 = vmatpush.bf16.msra.mxu3 %v274_v22  ;;  %v472_v34 = vld [vmem:[%s737_s6 + $0xc] sm:$0xf]  ;;  %v440_v35 = vld [vmem:[%s737_s6 + $0x18] sm:$0xf0]  ;;  %v439_v38 = vor.u32 %v474_v33, %v438_v31  ;;  %v192_v40 = vld [vmem:[%s808_s1] sm:$0xf] }
  0x32   : > { %206 = vperm.xlu0 %534, %v203_v32   ;;  %v443_v39 = vor.u32 %v472_v34, %v440_v35  ;;  %s479_s9 = sshll.u32 %s679_s16, 5  ;;  %s190_s19 = scalar_lea.vmem [#allocation5], %s427_s8 }
  0x33   : > { %s345_s17 = scalar_lea.hbm %s810_s3, %s479_s9  ;;  %s346_s20 = sshll.u32 %s190_s19, 4  ;;  %s776_s20 = int_to_ptr.vmem [resolvable:$true] %s346_s20 }
  0x34   : > { %282 = vmatpush.bf16.msra.mxu0 %v447_v23  ;;  %295 = vmatpush.bf16.msra.mxu1 %v451_v24  ;;  %s348_s26 = sshll.u32 %s345_s17, 4  ;;  %s334_s16 = scalar_lea.sflag [#allocation4], %s733_s28  ;;  %s349_s26 = int_to_ptr.hbm [resolvable:$true] %s348_s26 }
  0x35   : > { %308 = vmatpush.bf16.msra.mxu2 %v455_v28  ;;  %321 = vmatpush.bf16.msra.mxu3 %v459_v29  ;;  %s579_s25 = sshra.s32 %s349_s26, 4  ;;  %s585_s6 = scalar_lea.hbm %s810_s3, 96  ;;  %s580_s25 = int_to_ptr.hbm [resolvable:$true] %s579_s25 }
  0x36   : > { %s581_s27 = scalar_lea.hbm %s580_s25, 32  ;;  %p586_p1 = scmp.lt.s32.totalorder %s580_s25, %s810_s3 }
  0x37   : > { %p582_p6 = scmp.ne.s32.totalorder %s580_s25, %s581_s27  ;;  %p587_p2 = scmp.lt.s32.totalorder %s585_s6, %s581_s27 }
  0x38   : > { %283 = vmatpush.bf16.msra.mxu0 %v431_v36  ;;  %296 = vmatpush.bf16.msra.mxu1 %v435_v37 }
  0x39   : > { %309 = vmatpush.bf16.msra.mxu2 %v439_v38  ;;  %322 = vmatpush.bf16.msra.mxu3 %v443_v39  ;;  %p583_p12 = pnand %p582_p6, %p703_p10  ;;  %p588_p3 = por %p587_p2, %p586_p1 }
  0x3b   : > { %460 = vmatmul.msk.bf16.vlgmr.msra.gmra.mxu0 %vm259_vm1, %v192_v40  ;;  %461 = vmatmul.msk.bf16.vlgmr.msra.gmra.mxu1 %vm259_vm1, %v192_v40  ;;  %p584_p0 = pneg %p583_p12 }
  0x3c   : > { %462 = vmatmul.msk.bf16.vlgmr.msra.gmra.mxu2 %vm259_vm1, %v192_v40  ;;  %463 = vmatmul.msk.bf16.vlgmr.msra.gmra.mxu3 %vm259_vm1, %v192_v40 }
  0x3d   : > { %p589_p4 = pnand %p588_p3, %p584_p0 }
  0xa4   : > { %v207_v41 = vpop.permute.xlu0 %206 }
  0xb8   : > { %v285_v42 = vpop.f32.mrf.mxu0  ;;  %v298_v43 = vpop.f32.mrf.mxu1 }
  0xb9   : > { %v286_v44 = vadd.f32 %v285_v42, %v207_v41  ;;  %v299_v45 = vadd.f32 %v298_v43, %v207_v41 }
  0xbb   : > { %328 = vst [vmem:[%s190_s19] sm:$0xff] %v286_v44 }
  0xbc   : > { %329 = vst [vmem:[%s190_s19 + $0x8] sm:$0xff] %v299_v45 }
  0xbf   : > { %v311_v46 = vpop.f32.mrf.mxu2  ;;  %v324_v47 = vpop.f32.mrf.mxu3 }
  0xc0   : > { %v312_v48 = vadd.f32 %v311_v46, %v207_v41  ;;  %v325_v49 = vadd.f32 %v324_v47, %v207_v41  ;;  %v287_v50 = vpop.f32.mrf.mxu0  ;;  %v300_v51 = vpop.f32.mrf.mxu1 }
  0xc2   : > { %464 = vst [vmem:[%s190_s19 + $0x10] sm:$0xff] %v312_v48 }
  0xc3   : > { %465 = vst [vmem:[%s190_s19 + $0x18] sm:$0xff] %v325_v49 }
  0xc4   : > { %592 = shalt.err (!%p589_p4)
}
  0xc5   : > { %s636_s28 = smov 256   ;;  %s637_s5 = smov 16  }
  0xc6   : > { %485 = dma.vmem_to_hbm [thread:$0]  (%p703_p10), %s776_s20, 512, %s349_s26, %s334_s16, %s636_s28, %s636_s28, %s637_s5  }
  0xc7   : > { %v313_v52 = vpop.f32.mrf.mxu2  ;;  %v326_v53 = vpop.f32.mrf.mxu3 }
  0xc8 PF: > { %p496_p5 = scmp.ge.s32.totalorder %s631_s15, 2  ;;  %s363_s7 = sand.u32 1, %s619_s12  }
  0xc9   : > { %s364_s8 = scalar_lea.sflag [#allocation4], %s363_s7 }
  0xca   : > { %p492_p7 = pnand %p496_p5, %p707_p11 }
  0xcc   : > { %p493_p8 = pneg %p492_p7 }
  0xce   : > { %614 = dma.done.wait (%p493_p8), %s364_s8, 512  }
  0xcf   : > { %616 = vsyncadd (%p493_p8), %s364_s8, 4294966784  ;;  %p16_p10 = scmp.ge.s32.totalorder %s683_s18, 5   ;;  %s815_s12 = smov %s623_s13 }
  0xd0   : > { %s816_s13 = smov %s627_s14  ;;  %s817_s14 = smov %s695_s21 }
  0xd1   : > { %s818_s15 = smov %s683_s18  ;;  %18 = sbr.rel (!%p16_p10) target bundleno = 5 (0x5), region = 78 }
  0xd6   :  { %370 = vsyncpa [#allocation3], 1 }
  0xd7   :  { %372 = vsyncpa [#allocation3 + $0x1], 1 }
  0xd8   :  { %373 = vsyncpa [#allocation4], 1 }
  0xd9   :  { %375 = vsyncpa [#allocation4 + $0x1], 1 }

</bundles_post_ra>
